<compile_context>
chip_gen: v6e
topology: v6e:2x2x1
jax: 0.10.0
libtpu: 0.0.40
codegen_flags: <defaults>
</compile_context>

<pallas_src>
import math

import jax
import jax.numpy as jnp
from jax import lax
from jax.experimental import pallas as pl
from jax.experimental.pallas import tpu as pltpu


def _geglu_kernel(x_ref, wv_ref, wg_ref, bv_ref, bg_ref, o_ref):
    # x_ref : (tm, K)      row tile of the input (MXU dtype, typically bf16)
    # wv_ref: (K, tn)      "value" column block of the projection weight
    # wg_ref: (K, tn)      "gate"  column block of the projection weight
    # bv_ref, bg_ref: (1, tn) f32 bias blocks
    # o_ref : (tm, tn)
    x = x_ref[...]
    val = jnp.dot(x, wv_ref[...], preferred_element_type=jnp.float32) + bv_ref[...]
    gate = jnp.dot(x, wg_ref[...], preferred_element_type=jnp.float32) + bg_ref[...]
    # Exact GELU (matches torch.nn.functional.gelu default): 0.5*g*(1+erf(g/sqrt(2)))
    gelu_gate = 0.5 * gate * (1.0 + lax.erf(gate * 0.7071067811865476))
    o_ref[...] = (val * gelu_gate).astype(o_ref.dtype)


def _round_up(x, m):
    return ((x + m - 1) // m) * m


def _cdiv(a, b):
    return -(-a // b)


def _pick_col_tile(dout, max_tn):
    """Largest 128-multiple divisor of dout that is <= max_tn, so the gate
    half starts at an integer block offset of dout // tn."""
    max_tn = min(max_tn, dout)
    for cand in range((max_tn // 128) * 128, 0, -128):
        if dout % cand == 0:
            return cand
    # TODO(synk): pad dim_out up to a 128 multiple for widths with no aligned
    # divisor (e.g. 320); fall back to a single (possibly masked-store) block.
    return dout


def _vmem_capacity_bytes():
    try:
        info = pltpu.get_tpu_info()
        cap = getattr(info, "vmem_capacity_bytes", None)
        if cap:
            return int(cap)
    except Exception:
        pass
    return 64 * 1024 * 1024  # conservative: v7x per-TensorCore VMEM


def geglu(x, w, b, *, tm=256, tn=512, matmul_dtype=jnp.bfloat16):
    """GEGLU forward.

    x: (..., dim_in); w: (dim_in, 2*dim_out); b: (2*dim_out,).
    Returns (..., dim_out) in x.dtype.  `w` is consumed in its stored dtype —
    cast it to bf16 once at parameter-load time, not per call.
    """
    *lead, dim_in = x.shape
    two_dout = w.shape[1]
    dout = two_dout // 2
    M = math.prod(lead) if lead else 1
    out_dtype = x.dtype

    # Activations: cast once to the MXU dtype (amortized over n_col re-reads).
    x2d = x.reshape(M, dim_in)
    if matmul_dtype is not None and x2d.dtype != matmul_dtype:
        x2d = x2d.astype(matmul_dtype)
    b2d = b.reshape(1, two_dout).astype(jnp.float32)

    # Tile selection.  bf16 packs 2 rows per sublane -> minimum row tile 16.
    min_rows = 16 if jnp.dtype(x2d.dtype).itemsize < 4 else 8
    tm = max(min_rows, min(tm, _round_up(M, min_rows)))
    tm = _round_up(tm, min_rows)
    tn = _pick_col_tile(dout, tn)

    # VMEM budgeting (per generation).
    x_bytes = jnp.dtype(x2d.dtype).itemsize
    w_bytes = jnp.dtype(w.dtype).itemsize
    o_bytes = jnp.dtype(out_dtype).itemsize
    capacity = _vmem_capacity_bytes()
    budget = int(capacity * 0.75)

    def footprint(tm_, tn_, w_bufs):
        x_t = tm_ * dim_in * x_bytes
        w_t = 2 * dim_in * tn_ * w_bytes
        b_t = 2 * tn_ * 4
        o_t = tm_ * tn_ * o_bytes
        return 2 * (x_t + b_t + o_t) + w_bufs * w_t

    weight_single_buffered = False
    # Prefer shrinking tn while it stays a 128-multiple divisor of dout.
    while footprint(tm, tn, 2) > budget and tn > 128 and tn % 256 == 0:
        tn //= 2
    if footprint(tm, tn, 2) > budget:
        # Weights only change on the column axis: single-buffer them and
        # expose ~1 weight DMA per column switch instead of blowing VMEM.
        weight_single_buffered = True
    w_bufs = 1 if weight_single_buffered else 2
    while footprint(tm, tn, w_bufs) > budget and tm > min_rows:
        tm = max(min_rows, _round_up(tm // 2, min_rows))

    n_col = max(1, dout // tn)
    n_row = _cdiv(M, tm)            # ragged M: Pallas masks the last row block
    gate_off = n_col

    fp = footprint(tm, tn, w_bufs)
    vmem_limit = int(min(capacity - (4 << 20), max(fp + (8 << 20), 32 << 20)))

    # Grid ordering.  Columns lead (rows innermost -> weight blocks stay
    # VMEM-resident across the row sweep) when there are >= 2 column blocks;
    # otherwise rows lead so the v7x megacore still splits work across TCs.
    cols_outer = n_col >= 2
    if cols_outer:
        grid = (n_col, n_row)
        x_map = lambda j, i: (i, 0)
        wv_map = lambda j, i: (0, j)
        wg_map = lambda j, i: (0, j + gate_off)
        o_map = lambda j, i: (i, j)
    else:
        grid = (n_row, n_col)
        x_map = lambda i, j: (i, 0)
        wv_map = lambda i, j: (0, j)
        wg_map = lambda i, j: (0, j + gate_off)
        o_map = lambda i, j: (i, j)

    def w_spec(index_map):
        if weight_single_buffered:
            return pl.BlockSpec((dim_in, tn), index_map,
                                pipeline_mode=pl.Buffered(1))
        return pl.BlockSpec((dim_in, tn), index_map)

    in_specs = [
        pl.BlockSpec((tm, dim_in), x_map),   # x row tile
        w_spec(wv_map),                      # W value half
        w_spec(wg_map),                      # W gate half
        pl.BlockSpec((1, tn), wv_map),       # b value half
        pl.BlockSpec((1, tn), wg_map),       # b gate half
    ]
    out_specs = pl.BlockSpec((tm, tn), o_map)

    cost = pl.CostEstimate(
        flops=4 * M * dim_in * dout,
        transcendentals=M * dout,
        bytes_accessed=(M * dim_in * x_bytes * n_col
                        + dim_in * two_dout * w_bytes
                        + two_dout * 4
                        + M * dout * o_bytes),
    )

    out2d = pl.pallas_call(
        _geglu_kernel,
        out_shape=jax.ShapeDtypeStruct((M, dout), out_dtype),
        grid_spec=pltpu.PrefetchScalarGridSpec(
            num_scalar_prefetch=0,
            grid=grid,
            in_specs=in_specs,
            out_specs=out_specs,
        ),
        compiler_params=pltpu.CompilerParams(
            dimension_semantics=("parallel", "parallel"),
            vmem_limit_bytes=vmem_limit,
        ),
        cost_estimate=cost,
    )(x2d, w, w, b2d, b2d)

    return out2d.reshape(*lead, dout)


def geglu_reference(x, w, b):
    y = jnp.einsum("...i,io->...o", x, w) + b
    dout = y.shape[-1] // 2
    val, gate = y[..., :dout], y[..., dout:]
    return val * jax.nn.gelu(gate, approximate=False)


if __name__ == "__main__":
    key = jax.random.PRNGKey(0)
    batch, seq, dim_in, dim_out = 2, 8, 32, 256

    k_x, k_w, k_b = jax.random.split(key, 3)
    # Deterministic init mimicking nn.Linear's U(-1/sqrt(fan_in), 1/sqrt(fan_in)).
    bound = 1.0 / (dim_in ** 0.5)
    x = jax.random.normal(k_x, (batch, seq, dim_in), dtype=jnp.float32)
    w = jax.random.uniform(k_w, (dim_in, 2 * dim_out), jnp.float32, -bound, bound)
    b = jax.random.uniform(k_b, (2 * dim_out,), jnp.float32, -bound, bound)

    # Parameter-load-time cast: the kernel consumes W in bf16 without a
    # per-call astype (perf review item).
    w_param = w.astype(jnp.bfloat16)

    # Reference on bf16-rounded inputs (kernel feeds the MXU in bf16, accumulates f32).
    x_bf = x.astype(jnp.bfloat16).astype(jnp.float32)
    w_bf = w_param.astype(jnp.float32)
    ref = geglu_reference(x_bf, w_bf, b)

    # 1) Default (production-style) tiles — small problem collapses to one block.
    out = jax.block_until_ready(geglu(x, w_param, b))
    assert out.shape == (batch, seq, dim_out)
    assert jnp.allclose(out, ref, atol=1e-3, rtol=1e-3), "mismatch (default tiles)"

    # 2) Small tiles to exercise the 2-D grid (two column blocks, cols outermost)
    #    and the value/gate column index maps.  Minimum bf16 row tile is 16.
    out_tiled = jax.block_until_ready(geglu(x, w_param, b, tm=16, tn=128))
    assert jnp.allclose(out_tiled, ref, atol=1e-3, rtol=1e-3), "mismatch (tiled grid)"

    # 3) Ragged row count: no wrapper-side padding; Pallas masks the last row block.
    x_odd = x[:, :7, :]
    ref_odd = geglu_reference(x_odd.astype(jnp.bfloat16).astype(jnp.float32), w_bf, b)
    out_odd = jax.block_until_ready(geglu(x_odd, w_param, b))
    assert out_odd.shape == (batch, 7, dim_out)
    assert jnp.allclose(out_odd, ref_odd, atol=1e-3, rtol=1e-3), "mismatch (ragged M)"

    print("KERNEL_OK")
</pallas_src>

<mosaic_0001>
module attributes {stable_mosaic.version = 11 : i64} {
  func.func @_geglu_kernel(%arg0: i32, %arg1: i32, %arg2: memref<16x32xbf16, #tpu.memory_space<vmem>>, %arg3: memref<32x256xbf16, #tpu.memory_space<vmem>>, %arg4: memref<32x256xbf16, #tpu.memory_space<vmem>>, %arg5: memref<1x256xf32, #tpu.memory_space<vmem>>, %arg6: memref<1x256xf32, #tpu.memory_space<vmem>>, %arg7: memref<16x256xf32, #tpu.memory_space<vmem>>) attributes {dimension_semantics = [#tpu.dimension_semantics<parallel>, #tpu.dimension_semantics<parallel>], iteration_bounds = array<i64: 1, 1>, scalar_prefetch = 0 : i64, scratch_operands = 0 : i64, tpu.core_type = #tpu.core_type<tc>, window_params = [{transform_indices = @transform_0, window_bounds = array<i64: 16, 32>}, {transform_indices = @transform_1, window_bounds = array<i64: 32, 256>}, {transform_indices = @transform_2, window_bounds = array<i64: 32, 256>}, {transform_indices = @transform_3, window_bounds = array<i64: 1, 256>}, {transform_indices = @transform_4, window_bounds = array<i64: 1, 256>}, {transform_indices = @transform_5, window_bounds = array<i64: 16, 256>}]} {
    %c0 = arith.constant 0 : index
    %c0_0 = arith.constant 0 : index
    %0 = vector.load %arg2[%c0, %c0_0] : memref<16x32xbf16, #tpu.memory_space<vmem>>, vector<16x32xbf16>
    %c0_1 = arith.constant 0 : index
    %c0_2 = arith.constant 0 : index
    %1 = vector.load %arg3[%c0_1, %c0_2] : memref<32x256xbf16, #tpu.memory_space<vmem>>, vector<32x256xbf16>
    %cst = arith.constant dense<0.000000e+00> : vector<16x256xf32>
    %2 = tpu.matmul %0, %1, %cst {dimension_numbers = #tpu.dot_dimension_numbers<[1], [0], [0], [1], [0, 0, 1, 1], [], []>} : vector<16x32xbf16>, vector<32x256xbf16>, vector<16x256xf32> -> vector<16x256xf32>
    %c0_3 = arith.constant 0 : index
    %c0_4 = arith.constant 0 : index
    %3 = vector.load %arg5[%c0_3, %c0_4] : memref<1x256xf32, #tpu.memory_space<vmem>>, vector<1x256xf32>
    %4 = vector.broadcast %3 : vector<1x256xf32> to vector<16x256xf32>
    %5 = arith.addf %2, %4 : vector<16x256xf32>
    %c0_5 = arith.constant 0 : index
    %c0_6 = arith.constant 0 : index
    %6 = vector.load %arg4[%c0_5, %c0_6] : memref<32x256xbf16, #tpu.memory_space<vmem>>, vector<32x256xbf16>
    %cst_7 = arith.constant dense<0.000000e+00> : vector<16x256xf32>
    %7 = tpu.matmul %0, %6, %cst_7 {dimension_numbers = #tpu.dot_dimension_numbers<[1], [0], [0], [1], [0, 0, 1, 1], [], []>} : vector<16x32xbf16>, vector<32x256xbf16>, vector<16x256xf32> -> vector<16x256xf32>
    %c0_8 = arith.constant 0 : index
    %c0_9 = arith.constant 0 : index
    %8 = vector.load %arg6[%c0_8, %c0_9] : memref<1x256xf32, #tpu.memory_space<vmem>>, vector<1x256xf32>
    %9 = vector.broadcast %8 : vector<1x256xf32> to vector<16x256xf32>
    %10 = arith.addf %7, %9 : vector<16x256xf32>
    %cst_10 = arith.constant 5.000000e-01 : f32
    %11 = vector.broadcast %cst_10 : f32 to vector<16x256xf32>
    %12 = arith.mulf %11, %10 : vector<16x256xf32>
    %cst_11 = arith.constant 0.707106769 : f32
    %13 = vector.broadcast %cst_11 : f32 to vector<16x256xf32>
    %14 = arith.mulf %10, %13 : vector<16x256xf32>
    %15 = math.erf %14 : vector<16x256xf32>
    %cst_12 = arith.constant 1.000000e+00 : f32
    %16 = vector.broadcast %cst_12 : f32 to vector<16x256xf32>
    %17 = arith.addf %16, %15 : vector<16x256xf32>
    %18 = arith.mulf %12, %17 : vector<16x256xf32>
    %19 = arith.mulf %5, %18 : vector<16x256xf32>
    %c0_13 = arith.constant 0 : index
    %c0_14 = arith.constant 0 : index
    %20 = vector.load %arg7[%c0_13, %c0_14] : memref<16x256xf32, #tpu.memory_space<vmem>>, vector<16x256xf32>
    tpu.vector_store %arg7[%c0_13, %c0_14], %19 {strides = array<i32>} : memref<16x256xf32, #tpu.memory_space<vmem>>, vector<16x256xf32>,
    return
  }
  func.func @transform_0(%arg0: i32, %arg1: i32) -> (i32, i32) {
    %c0_i32 = arith.constant 0 : i32
    %c0_i32_0 = arith.constant 0 : i32
    return %arg0, %c0_i32 : i32, i32
  }
  func.func @transform_1(%arg0: i32, %arg1: i32) -> (i32, i32) {
    %c0_i32 = arith.constant 0 : i32
    %c0_i32_0 = arith.constant 0 : i32
    return %c0_i32, %arg1 : i32, i32
  }
  func.func @transform_2(%arg0: i32, %arg1: i32) -> (i32, i32) {
    %c1_i32 = arith.constant 1 : i32
    %0 = arith.addi %arg1, %c1_i32 : i32
    %c0_i32 = arith.constant 0 : i32
    %c0_i32_0 = arith.constant 0 : i32
    return %c0_i32, %0 : i32, i32
  }
  func.func @transform_3(%arg0: i32, %arg1: i32) -> (i32, i32) {
    %c0_i32 = arith.constant 0 : i32
    %c0_i32_0 = arith.constant 0 : i32
    return %c0_i32, %arg1 : i32, i32
  }
  func.func @transform_4(%arg0: i32, %arg1: i32) -> (i32, i32) {
    %c1_i32 = arith.constant 1 : i32
    %0 = arith.addi %arg1, %c1_i32 : i32
    %c0_i32 = arith.constant 0 : i32
    %c0_i32_0 = arith.constant 0 : i32
    return %c0_i32, %0 : i32, i32
  }
  func.func @transform_5(%arg0: i32, %arg1: i32) -> (i32, i32) {
    %c0_i32 = arith.constant 0 : i32
    return %arg0, %arg1 : i32, i32
  }
}

</mosaic_0001>

<bundles_post_ra>
// kernel: tpu_custom_call.1
= control target key start
LH: loop header
LB: loop body
LE: loop exit
PB: predicated region body
PF: predicated region fallthrough
CT: control target
= control target key end

     0   :  { %10 = vsyncpa [#allocation3], 0  ;;  %s531_s0 = inlined_call_operand.hbm [shape: bf16[16,32], index: 0, kind: input, shape index: {}]   ;;  %s532_s1 = inlined_call_operand.hbm [shape: bf16[32,512], index: 1, kind: input, shape index: {}]   ;;  %s533_s2 = inlined_call_operand.hbm [shape: bf16[32,512], index: 2, kind: input, shape index: {}]   ;;  %s534_s3 = inlined_call_operand.vmem [shape: f32[1,512], index: 3, kind: input, shape index: {}]   ;;  %s535_s4 = inlined_call_operand.hbm [shape: f32[1,512], index: 4, kind: input, shape index: {}]   ;;  %s536_s5 = inlined_call_operand.hbm [shape: f32[16,256], index: 5, kind: output, shape index: {}]  }
   0x1   :  { %11 = vsyncpa [#allocation6], 0 }
   0x2   :  { %12 = vsyncpa [#allocation9], 0 }
   0x3   :  { %13 = vsyncpa [#allocation4], 0  ;;  %s463_s18 = smov [#allocation5]  }
   0x4   :  { %s31_s19 = sshll.u32 %s463_s18, 4  ;;  %s32_s19 = int_to_ptr.vmem [resolvable:$true] %s31_s19 }
   0x5   :  { %s357_s20 = scalar_lea.vmem %s32_s19, 512  ;;  %p362_p1 = scmp.lt.s32.totalorder %s32_s19, %s32_s19 }
   0x6   :  { %p358_p0 = scmp.ne.s32.totalorder %s32_s19, %s357_s20  ;;  %p363_p2 = scmp.lt.s32.totalorder %s357_s20, %s357_s20 }
   0x8   :  { %p364_p3 = por %p363_p2, %p362_p1 }
   0xa   :  { %p365_p4 = pnand %p364_p3, %p358_p0 }
   0xc   :  { %368 = shalt.err (!%p365_p4)
}
   0xd   :  { %s464_s21 = smov 256   ;;  %s465_s22 = smov 128  }
   0xe   :  { %s466_s23 = smov 8   ;;  %s467_s26 = smov [#allocation2]  }
   0xf   :  { %37 = dma.hbm_to_vmem [thread:$0]  %s532_s1, 512, %s32_s19, [#allocation6], %s464_s21, %s465_s22, %s466_s23  }
  0x10   :  { %s19_s27 = sshll.u32 %s467_s26, 4  ;;  %s303_s30 = scalar_lea.hbm %s533_s2, 128  ;;  %s20_s27 = int_to_ptr.vmem [resolvable:$true] %s19_s27 }
  0x11   :  { %s377_s6 = scalar_lea.vmem %s20_s27, 128  ;;  %p382_p6 = scmp.lt.s32.totalorder %s20_s27, %s20_s27 }
  0x12   :  { %p378_p5 = scmp.ne.s32.totalorder %s20_s27, %s377_s6  ;;  %p383_p7 = scmp.lt.s32.totalorder %s377_s6, %s377_s6 }
  0x14   :  { %p384_p8 = por %p383_p7, %p382_p6 }
  0x16   :  { %p385_p9 = pnand %p384_p8, %p378_p5 }
  0x18   :  { %388 = shalt.err (!%p385_p9)
}
  0x19   :  { %s468_s7 = smov 64   ;;  %s469_s8 = smov 4  }
  0x1a   :  { %25 = dma.hbm_to_vmem [thread:$0]  %s531_s0, 128, %s20_s27, [#allocation3], %s468_s7, %s468_s7, %s469_s8  }
  0x1b   :  { %s304_s12 = scalar_lea.hbm %s535_s4, 32  ;;  %s470_s13 = smov [#allocation7]  }
  0x1c   :  { %s47_s14 = sshll.u32 %s470_s13, 4  ;;  %s471_s2 = smov [#allocation8]   ;;  %s48_s14 = int_to_ptr.vmem [resolvable:$true] %s47_s14 }
  0x1d   :  { %s66_s15 = sshll.u32 %s471_s2, 4  ;;  %s399_s16 = scalar_lea.vmem %s48_s14, 512  ;;  %s67_s15 = int_to_ptr.vmem [resolvable:$true] %s66_s15 }
  0x1e   :  { %p400_p10 = scmp.ne.s32.totalorder %s48_s14, %s399_s16  ;;  %p404_p11 = scmp.lt.s32.totalorder %s48_s14, %s48_s14 }
  0x1f   :  { %p405_p12 = scmp.lt.s32.totalorder %s399_s16, %s399_s16 }
  0x21   :  { %p406_p13 = por %p405_p12, %p404_p11 }
  0x23   :  { %p407_p0 = pnand %p406_p13, %p400_p10 }
  0x25   :  { %410 = shalt.err (!%p407_p0)
}
  0x26   :  { %53 = dma.hbm_to_vmem [thread:$0]  %s303_s30, 512, %s48_s14, [#allocation6], %s464_s21, %s465_s22, %s466_s23  }
  0x27   :  { %s422_s0 = scalar_lea.vmem %s67_s15, 32  ;;  %p427_p2 = scmp.lt.s32.totalorder %s67_s15, %s67_s15 }
  0x28   :  { %p423_p1 = scmp.ne.s32.totalorder %s67_s15, %s422_s0  ;;  %p428_p3 = scmp.lt.s32.totalorder %s422_s0, %s422_s0 }
  0x2a   :  { %p429_p4 = por %p428_p3, %p427_p2 }
  0x2c   :  { %p430_p5 = pnand %p429_p4, %p423_p1 }
  0x2e   :  { %433 = shalt.err (!%p430_p5)
}
  0x2f   :  { %69 = dma.hbm_to_vmem [thread:$0]  %s304_s12, 32, %s67_s15, [#allocation9]  }
  0x30   :  { %455 = dma.done.wait [#allocation3], 128  }
  0x31   :  { %456 = vsyncadd [#allocation3], 4294967168 }
  0x32   :  { %457 = dma.done.wait [#allocation6], 1024  }
  0x33   :  { %458 = vsyncadd [#allocation6], 4294966272 }
  0x34   :  { %459 = dma.done.wait [#allocation9], 32  }
  0x35   :  { %460 = vsyncadd [#allocation9], 4294967264  ;;  %v472_v0 = vmov 0   ;;  %v328_v1 = vld [vmem:[#allocation7 + $0x14] ss:$8 sps:$4 sm:$0xff]   ;;  %vm130_vm0 = vcmask 261120   ;;  %v95_v10 = vlaneseq }
  0x36   :  { %245 = vmatprep.mubr.bf16.mxu1 %v472_v0  ;;  %166 = vmatprep.mubr.bf16.mxu0 %v472_v0  ;;  %v330_v2 = vld [vmem:[#allocation7 + $0x10] ss:$8 sps:$4 sm:$0xff]   ;;  %v331_v3 = vld [vmem:[#allocation7 + $0x4] ss:$8 sps:$4 sm:$0xff]   ;;  %v333_v4 = vld [vmem:[#allocation7] ss:$8 sps:$4 sm:$0xff]  }
  0x37   :  { %225 = vmatprep.subr.bf16.mxu1 %v328_v1  ;;  %v335_v5 = vld [vmem:[#allocation5 + $0x14] ss:$8 sps:$4 sm:$0xff]   ;;  %v337_v6 = vld [vmem:[#allocation5 + $0x10] ss:$8 sps:$4 sm:$0xff]   ;;  %v338_v7 = vld [vmem:[#allocation5 + $0x4] ss:$8 sps:$4 sm:$0xff]  }
  0x38   :  { %226 = vmatpush1.bf16.msra.mxu1 %v330_v2  ;;  %v334_v8 = vld [vmem:[#allocation2] sm:$0xff]   ;;  %146 = vmatprep.subr.bf16.mxu0 %v335_v5  ;;  %v340_v9 = vld [vmem:[#allocation5] ss:$8 sps:$4 sm:$0xff]   ;;  %v96_v11 = vshrl.u32 %v95_v10, 7 }
  0x39   :  { %227 = vmatprep.subr.bf16.mxu1 %v331_v3  ;;  %147 = vmatpush1.bf16.msra.mxu0 %v337_v6  ;;  %v181_v13 = vld [vmem:[#allocation8] sm:$0x3]  ;;  %v93_v29 = vld [vmem:[%s534_s3] sm:$0x3]  ;;  %s473_s3 = smov [#allocation10]  }
  0x3a   :  { %148 = vmatprep.subr.bf16.mxu0 %v338_v7  ;;  %v97_v12 = vsub.s32 0, %v96_v11  ;;  %v101_v14 = vsub.s32 1, %v96_v11  ;;  %s289_s18 = sshll.u32 %s473_s3, 4  ;;  %s290_s18 = int_to_ptr.vmem [resolvable:$true] %s289_s18 }
  0x3b   :  { %s435_s19 = scalar_lea.vmem %s290_s18, 512  ;;  %p440_p7 = scmp.lt.s32.totalorder %s290_s18, %s290_s18 }
  0x3c   :  { %228 = vmatpush1.bf16.msra.mxu1 %v333_v4  ;;  %v186_v15 = vrot.slane %v181_v13, %v97_v12  ;;  %v190_v16 = vrot.slane %v181_v13, %v101_v14  ;;  %v98_v31 = vrot.slane %v93_v29, %v97_v12  ;;  %v102_v37 = vrot.slane %v93_v29, %v101_v14  ;;  %p436_p6 = scmp.ne.s32.totalorder %s290_s18, %s435_s19  ;;  %p441_p8 = scmp.lt.s32.totalorder %s435_s19, %s435_s19 }
  0x3d   :  { %149 = vmatpush1.bf16.msra.mxu0 %v340_v9 }
  0x3e   :  { %p442_p9 = por %p441_p8, %p440_p7 }
  0x3f   :  { %315 = vmatmul.mubr.msk.bf16.vlgmr.msra.gmra.mxu1 %vm130_vm0, %v334_v8 }
  0x40   :  { %310 = vmatmul.mubr.msk.bf16.vlgmr.msra.gmra.mxu0 %vm130_vm0, %v334_v8  ;;  %p443_p10 = pnand %p442_p9, %p436_p6 }
  0xff   :  { %v247_v17 = vpop.f32.mrf.mxu1 }
 0x100   :  { %v248_v18 = vadd.f32 %v247_v17, %v186_v15  ;;  %v168_v30 = vpop.f32.mrf.mxu0 }
 0x101   :  { %v249_v19 = vpop.f32.mrf.mxu1  ;;  %v169_v35 = vadd.f32 %v168_v30, %v98_v31 }
 0x102   :  { %v260_v20 = vmul.f32 0.70710677, %v248_v18  ;;  %v250_v21 = vadd.f32 %v249_v19, %v190_v16  ;;  %v170_v32 = vpop.f32.mrf.mxu0  ;;  %v256_v34 = vmul.f32 0.5, %v248_v18 }
 0x103   :  { %v251_v22 = vpop.f32.mrf.mxu1  ;;  %v171_v46 = vadd.f32 %v170_v32, %v102_v37 }
 0x104   :  { %341 = verf.f32 %v260_v20  ;;  %v261_v23 = vmul.f32 0.70710677, %v250_v21  ;;  %v252_v24 = vadd.f32 %v251_v22, %v186_v15  ;;  %v172_v39 = vpop.f32.mrf.mxu0  ;;  %v257_v40 = vmul.f32 0.5, %v250_v21 }
 0x105   :  { %v253_v25 = vpop.f32.mrf.mxu1  ;;  %v173_v53 = vadd.f32 %v172_v39, %v98_v31 }
 0x106   :  { %343 = verf.f32 %v261_v23  ;;  %v262_v26 = vmul.f32 0.70710677, %v252_v24  ;;  %v254_v27 = vadd.f32 %v253_v25, %v190_v16  ;;  %v258_v44 = vmul.f32 0.5, %v252_v24  ;;  %v174_v51 = vpop.f32.mrf.mxu0 }
 0x107   :  { %v175_v57 = vadd.f32 %v174_v51, %v102_v37 }
 0x108   :  { %345 = verf.f32 %v262_v26  ;;  %v263_v28 = vmul.f32 0.70710677, %v254_v27  ;;  %v259_v50 = vmul.f32 0.5, %v254_v27 }
 0x10a   :  { %347 = verf.f32 %v263_v28 }
 0x111   :  { %v342_v33 = vpop.eup %341 }
 0x112   :  { %v268_v36 = vadd.f32 1.0, %v342_v33 }
 0x113   :  { %v344_v38 = vpop.eup %343 }
 0x114   :  { %v272_v41 = vmul.f32 %v268_v36, %v256_v34  ;;  %v269_v42 = vadd.f32 1.0, %v344_v38 }
 0x115   :  { %v346_v43 = vpop.eup %345 }
 0x116   :  { %v276_v45 = vmul.f32 %v272_v41, %v169_v35  ;;  %v273_v47 = vmul.f32 %v269_v42, %v257_v40  ;;  %v270_v48 = vadd.f32 1.0, %v346_v43 }
 0x117   :  { %v348_v49 = vpop.eup %347 }
 0x118   :  { %280 = vst [vmem:[#allocation10] sm:$0xff] %v276_v45  ;;  %v277_v52 = vmul.f32 %v273_v47, %v171_v46  ;;  %v274_v54 = vmul.f32 %v270_v48, %v258_v44  ;;  %v271_v55 = vadd.f32 1.0, %v348_v49 }
 0x11a   :  { %281 = vst [vmem:[#allocation10 + $0x8] sm:$0xff] %v277_v52  ;;  %v278_v56 = vmul.f32 %v274_v54, %v173_v53  ;;  %v275_v58 = vmul.f32 %v271_v55, %v259_v50 }
 0x11c   :  { %282 = vst [vmem:[#allocation10 + $0x10] sm:$0xff] %v278_v56  ;;  %v279_v59 = vmul.f32 %v275_v58, %v175_v57 }
 0x11e   :  { %283 = vst [vmem:[#allocation10 + $0x18] sm:$0xff] %v279_v59 }
 0x11f   :  { %446 = shalt.err (!%p443_p10)
}
 0x120   :  { %s474_s20 = smov 16  }
 0x121   :  { %295 = dma.vmem_to_hbm [thread:$0]  %s290_s18, 512, %s536_s5, [#allocation4], %s464_s21, %s464_s21, %s474_s20  }
 0x122   :  { %461 = dma.done.wait [#allocation4], 512  }
 0x123   :  { %462 = vsyncadd [#allocation4], 4294966784 }
 0x124   :  { %299 = vsyncpa [#allocation3], 1 }
 0x125   :  { %300 = vsyncpa [#allocation6], 1 }
 0x126   :  { %301 = vsyncpa [#allocation9], 1 }
 0x127   :  { %302 = vsyncpa [#allocation4], 1 }

</bundles_post_ra>
